<compile_context>
chip_gen: v7x
topology: tpu7x:2x2x1
jax: 0.10.0
libtpu: 0.0.40
codegen_flags: <defaults>
</compile_context>

<pallas_src>
import jax
import jax.numpy as jnp
from jax.experimental import pallas as pl
from jax.experimental.pallas import tpu as pltpu

MAX_DEVIATION = 5.0
INV_MAX_DEVIATION = 1.0 / MAX_DEVIATION
EPS = 1e-6

_VMEM_LIMIT_BYTES = 48 * 1024 * 1024   # > v5e/v6e scoped defaults, < v7x 64 MiB physical
_VMEM_BUDGET_BYTES = 44 * 1024 * 1024  # headroom under the limit when sizing tb


def _round_up(x, m):
    return -(-x // m) * m


def _softclamp(x, lo, hi):
    mid = (lo + hi) * 0.5
    half = (hi - lo) * 0.5
    return mid + half * jnp.tanh((x - mid) / half)


def lgm_scale_diags(scale_diag):
    """Input-independent scale diagonal: compute once at parameter init."""
    return _softclamp(scale_diag.astype(jnp.float32), EPS, MAX_DEVIATION)


def _lgm_loc_kernel(x_ref, w_ref, b_ref, loc_ref):
    # Linear layer on the MXU, accumulate in f32.
    y = jnp.dot(x_ref[...], w_ref[...], preferred_element_type=jnp.float32)
    y = y + b_ref[...]  # (tb, D_out) + (1, D_out) broadcast
    # softclamp(y, -MAX_DEVIATION, +MAX_DEVIATION): symmetric -> mid=0, half=MAX_DEVIATION.
    loc_ref[...] = (MAX_DEVIATION * jnp.tanh(y * INV_MAX_DEVIATION)).astype(loc_ref.dtype)


def _select_tb(B, d_in, d_out_pad, tb_req):
    """Batch tile: multiple of 8, grid >= 2 steps when possible, VMEM-budgeted."""
    tb = _round_up(max(8, int(tb_req)), 8)
    tb = min(tb, _round_up(B, 8))
    if B > 8:
        # Keep at least 2 grid steps so v7x megacore can shard the parallel axis.
        tb = min(tb, _round_up(pl.cdiv(B, 2), 8))

    d_in_lanes = _round_up(d_in, 128)  # x block lane-pads to 128 lanes in VMEM

    def vmem_need(t):
        per_row = (d_in_lanes + d_out_pad) * 4                 # x block + out block (f32)
        resident = (d_in_lanes * d_out_pad + d_out_pad) * 4    # W + b
        return 2 * t * per_row + 2 * resident                  # x2: double buffering

    while tb > 8 and vmem_need(tb) > _VMEM_BUDGET_BYTES:
        tb = max(8, _round_up(tb // 2, 8))
    return tb


def lgm_forward_locs(x, w, b, *, tb=1024, out_dtype=jnp.float32):
    """locs = softclamp(x @ w + b, -MAX_DEVIATION, +MAX_DEVIATION).

    x: (B, D_in) f32,  w: (D_in, D_out) f32 (torch Linear weight pre-transposed),
    b: (D_out,) f32.   tb: requested batch tile (rows per grid step).
    """
    B, d_in = x.shape
    d_out = w.shape[1]

    # Lane-dense output features: pad to a multiple of 128 so stores are unmasked vst.
    d_out_pad = _round_up(d_out, 128)
    if d_out_pad != d_out:
        w = jnp.zeros((d_in, d_out_pad), w.dtype).at[:, :d_out].set(w)
        b = jnp.zeros((d_out_pad,), b.dtype).at[:d_out].set(b)
    b2 = b.reshape(1, d_out_pad)

    tb = _select_tb(B, d_in, d_out_pad, tb)
    grid = (pl.cdiv(B, tb),)  # ragged last block allowed: OOB rows masked on store

    cost = pl.CostEstimate(
        flops=2 * B * d_in * d_out_pad,
        transcendentals=B * d_out_pad,
        bytes_accessed=4 * (B * d_in + d_in * d_out_pad + d_out_pad + B * d_out_pad),
    )

    locs = pl.pallas_call(
        _lgm_loc_kernel,
        out_shape=jax.ShapeDtypeStruct((B, d_out_pad), out_dtype),
        grid_spec=pltpu.PrefetchScalarGridSpec(
            num_scalar_prefetch=0,
            grid=grid,
            in_specs=[
                pl.BlockSpec((tb, d_in), lambda i: (i, 0)),        # x tile, pipelined
                pl.BlockSpec((d_in, d_out_pad), lambda i: (0, 0)),  # W resident
                pl.BlockSpec((1, d_out_pad), lambda i: (0, 0)),     # b resident
            ],
            out_specs=pl.BlockSpec((tb, d_out_pad), lambda i: (i, 0)),
        ),
        compiler_params=pltpu.CompilerParams(
            dimension_semantics=("parallel",),
            vmem_limit_bytes=_VMEM_LIMIT_BYTES,
        ),
        cost_estimate=cost,
    )(x, w, b2)

    if d_out_pad != d_out:
        locs = locs[:, :d_out]  # tiny relative to the saved store-path cost
    return locs


if __name__ == "__main__":
    # Small shapes consistent with the module; D_OUT lane-dense (128), B gives a
    # 2-step pipelined / megacore-shardable grid.
    B, D_IN, D_OUT = 256, 32, 128

    key = jax.random.PRNGKey(0)
    kx, kw, kb, kx2 = jax.random.split(key, 4)

    # torch.nn.Linear-style init: uniform in [-1/sqrt(fan_in), 1/sqrt(fan_in)].
    bound = 1.0 / (D_IN ** 0.5)
    w = jax.random.uniform(kw, (D_IN, D_OUT), jnp.float32, -bound, bound)
    b = jax.random.uniform(kb, (D_OUT,), jnp.float32, -bound, bound)
    # constant_scale_diag = full((output_dim,), 0.05)  (identity_covariance=False)
    scale_diag_param = jnp.full((D_OUT,), 0.05, dtype=jnp.float32)

    # "Init-time": scale_diags depends only on a constant parameter.
    scale_diags = lgm_scale_diags(scale_diag_param)

    x = jax.random.normal(kx, (B, D_IN), jnp.float32)
    locs = lgm_forward_locs(x, w, b)
    jax.block_until_ready((locs, scale_diags))

    # Pure-JAX reference check.
    ref_locs = _softclamp(x @ w + b, -MAX_DEVIATION, MAX_DEVIATION)
    ref_scales = _softclamp(scale_diag_param, EPS, MAX_DEVIATION)
    assert locs.shape == (B, D_OUT)
    assert jnp.allclose(locs, ref_locs, atol=1e-5, rtol=1e-5)
    assert jnp.allclose(scale_diags, ref_scales, atol=1e-5, rtol=1e-5)

    # Ragged-batch check: B % tb != 0 exercises the masked last block
    # (no host-side pad of x, no output slice on the batch dim).
    B2 = 100
    x2 = jax.random.normal(kx2, (B2, D_IN), jnp.float32)
    locs2 = lgm_forward_locs(x2, w, b, tb=64)
    jax.block_until_ready(locs2)
    ref_locs2 = _softclamp(x2 @ w + b, -MAX_DEVIATION, MAX_DEVIATION)
    assert locs2.shape == (B2, D_OUT)
    assert jnp.allclose(locs2, ref_locs2, atol=1e-5, rtol=1e-5)

    print("KERNEL_OK")
</pallas_src>

<mosaic_0001>
module attributes {stable_mosaic.version = 11 : i64} {
  func.func @_lgm_loc_kernel(%arg0: i32, %arg1: memref<128x32xf32, #tpu.memory_space<vmem>>, %arg2: memref<32x128xf32, #tpu.memory_space<vmem>>, %arg3: memref<1x128xf32, #tpu.memory_space<vmem>>, %arg4: memref<128x128xf32, #tpu.memory_space<vmem>>) attributes {dimension_semantics = [#tpu.dimension_semantics<parallel>], iteration_bounds = array<i64: 2>, scalar_prefetch = 0 : i64, scratch_operands = 0 : i64, tpu.core_type = #tpu.core_type<tc>, window_params = [{transform_indices = @transform_0, window_bounds = array<i64: 128, 32>}, {pipeline_mode = #tpu.pipeline_mode<synchronous>, transform_indices = @transform_1, window_bounds = array<i64: 32, 128>}, {pipeline_mode = #tpu.pipeline_mode<synchronous>, transform_indices = @transform_2, window_bounds = array<i64: 1, 128>}, {transform_indices = @transform_3, window_bounds = array<i64: 128, 128>}]} {
    %c0 = arith.constant 0 : index
    %c0_0 = arith.constant 0 : index
    %0 = vector.load %arg1[%c0, %c0_0] : memref<128x32xf32, #tpu.memory_space<vmem>>, vector<128x32xf32>
    %c0_1 = arith.constant 0 : index
    %c0_2 = arith.constant 0 : index
    %1 = vector.load %arg2[%c0_1, %c0_2] : memref<32x128xf32, #tpu.memory_space<vmem>>, vector<32x128xf32>
    %cst = arith.constant dense<0.000000e+00> : vector<128x128xf32>
    %2 = tpu.matmul %0, %1, %cst {dimension_numbers = #tpu.dot_dimension_numbers<[1], [0], [0], [1], [0, 0, 1, 1], [], []>} : vector<128x32xf32>, vector<32x128xf32>, vector<128x128xf32> -> vector<128x128xf32>
    %c0_3 = arith.constant 0 : index
    %c0_4 = arith.constant 0 : index
    %3 = vector.load %arg3[%c0_3, %c0_4] : memref<1x128xf32, #tpu.memory_space<vmem>>, vector<1x128xf32>
    %4 = vector.broadcast %3 : vector<1x128xf32> to vector<128x128xf32>
    %5 = arith.addf %2, %4 : vector<128x128xf32>
    %cst_5 = arith.constant 2.000000e-01 : f32
    %6 = vector.broadcast %cst_5 : f32 to vector<128x128xf32>
    %7 = arith.mulf %5, %6 : vector<128x128xf32>
    %8 = math.tanh %7 : vector<128x128xf32>
    %cst_6 = arith.constant 5.000000e+00 : f32
    %9 = vector.broadcast %cst_6 : f32 to vector<128x128xf32>
    %10 = arith.mulf %9, %8 : vector<128x128xf32>
    %c0_7 = arith.constant 0 : index
    %c0_8 = arith.constant 0 : index
    %11 = vector.load %arg4[%c0_7, %c0_8] : memref<128x128xf32, #tpu.memory_space<vmem>>, vector<128x128xf32>
    tpu.vector_store %arg4[%c0_7, %c0_8], %10 {strides = array<i32>} : memref<128x128xf32, #tpu.memory_space<vmem>>, vector<128x128xf32>,
    return
  }
  func.func @transform_0(%arg0: i32) -> (i32, i32) {
    %c0_i32 = arith.constant 0 : i32
    %c0_i32_0 = arith.constant 0 : i32
    return %arg0, %c0_i32 : i32, i32
  }
  func.func @transform_1(%arg0: i32) -> (i32, i32) {
    %c0_i32 = arith.constant 0 : i32
    %c0_i32_0 = arith.constant 0 : i32
    %c0_i32_1 = arith.constant 0 : i32
    return %c0_i32, %c0_i32_0 : i32, i32
  }
  func.func @transform_2(%arg0: i32) -> (i32, i32) {
    %c0_i32 = arith.constant 0 : i32
    %c0_i32_0 = arith.constant 0 : i32
    %c0_i32_1 = arith.constant 0 : i32
    return %c0_i32, %c0_i32_0 : i32, i32
  }
  func.func @transform_3(%arg0: i32) -> (i32, i32) {
    %c0_i32 = arith.constant 0 : i32
    %c0_i32_0 = arith.constant 0 : i32
    return %arg0, %c0_i32 : i32, i32
  }
}

</mosaic_0001>

<bundles_post_ra>
// kernel: tpu_custom_call.1
= control target key start
LH: loop header
LB: loop body
LE: loop exit
PB: predicated region body
PF: predicated region fallthrough
CT: control target
= control target key end

     0   :  { %8 = vsyncpa [#allocation3], 0  ;;  %s961_s0 = inlined_call_operand.vmem [shape: f32[256,32], index: 0, kind: input, shape index: {}]   ;;  %s962_s1 = inlined_call_operand.vmem [shape: f32[32,128], index: 1, kind: input, shape index: {}]   ;;  %s963_s2 = inlined_call_operand.vmem [shape: f32[1,128], index: 2, kind: input, shape index: {}]   ;;  %s964_s3 = inlined_call_operand.hbm [shape: f32[256,128], index: 3, kind: output, shape index: {}]  }
   0x1   :  { %10 = vsyncpa [#allocation3 + $0x1], 0  ;;  %s787_s12 = smov 0   ;;  %s789_s13 = smov 0  }
   0x2   :  { %s791_s14 = smov 0   ;;  %s793_s15 = smov 0  }
   0x3 LB: > { %s808_s16 = sadd.s32 4294967295, %s762_s15   ;;  %s533_s17 = sadd.s32 4294967294, %s762_s15   ;;  %s762_s15 = sphi %s793_s15, %s970_s15   ;;  %s758_s14 = sphi %s791_s14, %s969_s14   ;;  %s754_s13 = sphi %s789_s13, %s968_s13   ;;  %s750_s12 = sphi %s787_s12, %s967_s12  }
   0x4   : > { %s812_s18 = sadd.s32 1, %s762_s15   ;;  %s91_s19 = sadd.s32 1, %s758_s14 }
   0x5   : > { %s88_s20 = ssub.s32 %s762_s15, %s812_s18  ;;  %p101_p0 = scmp.ne.s32.totalorder %s758_s14, %s754_s13 }
   0x6   : > { %p89_p1 = scmp.eq.s32.totalorder %s88_s20, 0  ;;  %p102_p2 = scmp.eq.s32.totalorder %s808_s16, 1 }
   0x7   : > { %p107_p3 = scmp.ne.s32.totalorder %s754_s13, %s750_s12  ;;  %p108_p4 = scmp.eq.s32.totalorder %s533_s17, 1 }
   0x8   : > { %s823_s21 = scalar_select %p89_p1, %s758_s14, %s91_s19  }
   0x9   : > { %p825_p5 = por %p102_p2, %p101_p0  ;;  %p829_p6 = por %p108_p4, %p107_p3 }
   0xa   : > { %p536_p7 = scmp.ge.s32.totalorder %s762_s15, 1  ;;  %p141_p8 = scmp.lt.s32.totalorder %s762_s15, 3 }
   0xc   : > { %p142_p9 = pnand %p536_p7, %p141_p8 }
   0xd   : > { %v188_v0 = vld [vmem:[%s962_s1] sm:$0xff] (!%p142_p9)  ;;  %v189_v1 = vld [vmem:[%s962_s1 + $0x8] sm:$0xff] (!%p142_p9)  ;;  %v190_v2 = vld [vmem:[%s962_s1 + $0x10] sm:$0xff] (!%p142_p9)  ;;  %s538_s30 = sshll.u32 (!%p142_p9), %s808_s16, 4  ;;  %vm199_vm0 = vcmask (!%p142_p9), 261120   ;;  %s162_s17 = sand.u32 (!%p142_p9), 1, %s754_s13  }
   0xe   : > { %145 = sbr.rel (%p142_p9) target bundleno = 285 (0x11d), region = 32  ;;  %v615_v3 = vpack.c.bf16 (!%p142_p9), %v189_v1, %v188_v0  ;;  %v191_v4 = vld [vmem:[%s962_s1 + $0x18] sm:$0xff] (!%p142_p9)  ;;  %p166_p10 = scmp.lt.s32.totalorder (!%p142_p9), %s538_s30, 31  ;;  %v540_v22 = vld [vmem:[%s963_s2] ss:$0 sm:$0xff] (!%p142_p9) }
   0xf   : > { %v619_v5 = vpack.c.bf16 (!%p142_p9), %v191_v4, %v190_v2  ;;  %s537_s19 = sshll.u32 (!%p142_p9), %s162_s17, 7  ;;  %s562_s24 = sshll.u32 (!%p142_p9), %s808_s16, 11 }
  0x10   : > { %616 = vmatprep.subr.bf16.mxu0 (!%p142_p9), %v615_v3  ;;  %623 = vmatprep.subr.bf16.mxu1 (!%p142_p9), %v615_v3  ;;  %s891_s20 = scalar_lea.vmem (!%p142_p9), [#allocation2], %s537_s19  ;;  %s911_s28 = scalar_lea.hbm (!%p142_p9), %s964_s3, %s562_s24 }
  0x11   : > { %618 = vmatpush3.bf16.msra.mxu0 (!%p142_p9), %v615_v3  ;;  %625 = vmatpush3.bf16.msra.mxu1 (!%p142_p9), %v615_v3  ;;  %s471_s25 = sshll.u32 (!%p142_p9), %s891_s20, 4  ;;  %s920_s16 = scalar_lea.sflag (!%p142_p9), [#allocation3], %s162_s17  ;;  %s913_s25 = int_to_ptr.vmem [resolvable:$true] %s471_s25 }
  0x12   : > { %620 = vmatprep.subr.bf16.mxu0 (!%p142_p9), %v619_v5  ;;  %624 = vmatprep.subr.bf16.mxu1 (!%p142_p9), %v619_v5  ;;  %s700_s29 = scalar_lea.vmem (!%p142_p9), %s913_s25, 2048 }
  0x13   : > { %p701_p11 = scmp.ne.s32.totalorder (!%p142_p9), %s913_s25, %s700_s29 }
  0x15   : > { %s972_s30 = smov (!%p166_p10, %s538_s30), 31  ;;  %622 = vmatpush3.bf16.msra.mxu0 %v619_v5  ;;  %626 = vmatpush3.bf16.msra.mxu1 %v619_v5  ;;  %p702_p12 = pnand %p701_p11, %p825_p5 }
  0x16   : > { %s539_s6 = sshll.u32 %s972_s30, 3  ;;  %s764_s30 = smov [#allocation2]  }
  0x17   : > { %s851_s9 = scalar_lea.vmem %s961_s0, %s539_s6  ;;  %p703_p13 = pneg %p702_p12 }
  0x18   : > { %v172_v6 = vld [vmem:[%s851_s9] sm:$0xff]  ;;  %v173_v8 = vld [vmem:[%s851_s9 + $0x8] sm:$0xff]  ;;  %v174_v10 = vld [vmem:[%s851_s9 + $0x10] sm:$0xff]  ;;  %s704_s4 = sshll.u32 %s764_s30, 4  ;;  %s705_s4 = int_to_ptr.vmem [resolvable:$false] %s704_s4 }
  0x19   : > { %v180_v7 = vld [vmem:[%s851_s9 + $0x40] sm:$0xff]  ;;  %v181_v9 = vld [vmem:[%s851_s9 + $0x48] sm:$0xff]  ;;  %591 = vmatprep.mubr.msk.f32.mxu0 %vm199_vm0, %v172_v6  ;;  %v182_v11 = vld [vmem:[%s851_s9 + $0x50] sm:$0xff]  ;;  %s706_s5 = scalar_lea.vmem %s705_s4, 4096  ;;  %p707_p0 = scmp.lt.s32.totalorder %s913_s25, %s705_s4 }
  0x1a   : > { %603 = vmatprep.mubr.msk.f32.mxu1 %vm199_vm0, %v180_v7  ;;  %592 = vmatmul.mubr.msk.f32.vlgmr.msra.gmra.mrb[0].mxu0 %vm199_vm0, %v173_v8  ;;  %v175_v12 = vld [vmem:[%s851_s9 + $0x18] sm:$0xff]  ;;  %v176_v14 = vld [vmem:[%s851_s9 + $0x20] sm:$0xff]  ;;  %v177_v16 = vld [vmem:[%s851_s9 + $0x28] sm:$0xff]  ;;  %p708_p1 = scmp.lt.s32.totalorder %s706_s5, %s700_s29 }
  0x1b   : > { %604 = vmatmul.mubr.msk.f32.vlgmr.msra.gmra.mrb[0].mxu1 %vm199_vm0, %v181_v9  ;;  %594 = vmatprep.mubr.msk.f32.mxu0 %vm199_vm0, %v174_v10  ;;  %v183_v13 = vld [vmem:[%s851_s9 + $0x58] sm:$0xff]  ;;  %v184_v15 = vld [vmem:[%s851_s9 + $0x60] sm:$0xff]  ;;  %v185_v17 = vld [vmem:[%s851_s9 + $0x68] sm:$0xff] }
  0x1c   : > { %606 = vmatprep.mubr.msk.f32.mxu1 %vm199_vm0, %v182_v11  ;;  %v178_v18 = vld [vmem:[%s851_s9 + $0x30] sm:$0xff]  ;;  %v179_v20 = vld [vmem:[%s851_s9 + $0x38] sm:$0xff]  ;;  %p709_p2 = por %p708_p1, %p707_p0 }
  0x1d   : > { %v186_v19 = vld [vmem:[%s851_s9 + $0x70] sm:$0xff]  ;;  %v187_v21 = vld [vmem:[%s851_s9 + $0x78] sm:$0xff] }
  0x1e   : > { %595 = vmatmul.mubr.msk.f32.gmra.mrb[2].mxu0 %vm199_vm0, %v175_v12  ;;  %p710_p3 = pnand %p709_p2, %p703_p13 }
  0x1f   : > { %607 = vmatmul.mubr.msk.f32.gmra.mrb[2].mxu1 %vm199_vm0, %v183_v13  ;;  %597 = vmatprep.mubr.msk.f32.mxu0 %vm199_vm0, %v176_v14 }
  0x20   : > { %609 = vmatprep.mubr.msk.f32.mxu1 %vm199_vm0, %v184_v15 }
  0x22   : > { %598 = vmatmul.mubr.msk.f32.gmra.mrb[4].mxu0 %vm199_vm0, %v177_v16 }
  0x23   : > { %610 = vmatmul.mubr.msk.f32.gmra.mrb[4].mxu1 %vm199_vm0, %v185_v17  ;;  %600 = vmatprep.mubr.msk.f32.mxu0 %vm199_vm0, %v178_v18 }
  0x24   : > { %612 = vmatprep.mubr.msk.f32.mxu1 %vm199_vm0, %v186_v19 }
  0x26   : > { %601 = vmatmul.mubr.msk.f32.gmra.mrb[6].mxu0 %vm199_vm0, %v179_v20 }
  0x27   : > { %613 = vmatmul.mubr.msk.f32.gmra.mrb[6].mxu1 %vm199_vm0, %v187_v21 }
  0xed   : > { %v593_v23 = vpop.f32.mrb[0].mxu0 }
  0xee   : > { %v605_v24 = vpop.f32.mrb[0].mxu1  ;;  %v320_v25 = vadd.f32 %v593_v23, %v540_v22  ;;  %v314_v27 = vpop.f32.mrb[1].mxu0 }
  0xef   : > { %v360_v26 = vadd.f32 %v605_v24, %v540_v22  ;;  %v354_v28 = vpop.f32.mrb[1].mxu1  ;;  %v315_v29 = vadd.f32 %v540_v22, %v314_v27 }
  0xf0   : > { %v355_v30 = vadd.f32 %v540_v22, %v354_v28  ;;  %v394_v31 = vmul.f32 0.2, %v320_v25 }
  0xf1   : > { %v402_v32 = vmul.f32 0.2, %v360_v26  ;;  %v393_v33 = vmul.f32 0.2, %v315_v29  ;;  %v596_v35 = vpop.f32.mrb[2].mxu0 }
  0xf2   : > { %v401_v34 = vmul.f32 0.2, %v355_v30  ;;  %v608_v36 = vpop.f32.mrb[2].mxu1  ;;  %668 = vtanh.f32 %v394_v31  ;;  %v330_v37 = vadd.f32 %v596_v35, %v540_v22  ;;  %v324_v39 = vpop.f32.mrb[3].mxu0 }
  0xf3   : > { %v370_v38 = vadd.f32 %v608_v36, %v540_v22  ;;  %v364_v40 = vpop.f32.mrb[3].mxu1  ;;  %670 = vtanh.f32 %v402_v32  ;;  %v325_v41 = vadd.f32 %v540_v22, %v324_v39 }
  0xf4   : > { %v365_v42 = vadd.f32 %v540_v22, %v364_v40  ;;  %672 = vtanh.f32 %v393_v33  ;;  %v396_v43 = vmul.f32 0.2, %v330_v37 }
  0xf5   : > { %v404_v44 = vmul.f32 0.2, %v370_v38  ;;  %674 = vtanh.f32 %v401_v34  ;;  %v395_v45 = vmul.f32 0.2, %v325_v41  ;;  %v599_v47 = vpop.f32.mrb[4].mxu0 }
  0xf6   : > { %v403_v46 = vmul.f32 0.2, %v365_v42  ;;  %v611_v48 = vpop.f32.mrb[4].mxu1  ;;  %676 = vtanh.f32 %v396_v43  ;;  %v340_v49 = vadd.f32 %v599_v47, %v540_v22  ;;  %v334_v51 = vpop.f32.mrb[5].mxu0 }
  0xf7   : > { %v380_v50 = vadd.f32 %v611_v48, %v540_v22  ;;  %v374_v52 = vpop.f32.mrb[5].mxu1  ;;  %678 = vtanh.f32 %v404_v44  ;;  %v335_v53 = vadd.f32 %v540_v22, %v334_v51 }
  0xf8   : > { %v375_v54 = vadd.f32 %v540_v22, %v374_v52  ;;  %680 = vtanh.f32 %v395_v45  ;;  %v398_v55 = vmul.f32 0.2, %v340_v49 }
  0xf9   : > { %v406_v56 = vmul.f32 0.2, %v380_v50  ;;  %682 = vtanh.f32 %v403_v46  ;;  %v397_v57 = vmul.f32 0.2, %v335_v53  ;;  %v602_v59 = vpop.f32.mrb[6].mxu0 }
  0xfa   : > { %v405_v58 = vmul.f32 0.2, %v375_v54  ;;  %v614_v60 = vpop.f32.mrb[6].mxu1  ;;  %684 = vtanh.f32 %v398_v55  ;;  %v350_v61 = vadd.f32 %v602_v59, %v540_v22  ;;  %v344_v63 = vpop.f32.mrb[7].mxu0 }
  0xfb   : > { %v390_v62 = vadd.f32 %v614_v60, %v540_v22  ;;  %v384_v0 = vpop.f32.mrb[7].mxu1  ;;  %686 = vtanh.f32 %v406_v56  ;;  %v345_v1 = vadd.f32 %v540_v22, %v344_v63 }
  0xfc   : > { %v385_v2 = vadd.f32 %v540_v22, %v384_v0  ;;  %v669_v3 = vpop.eup %668  ;;  %688 = vtanh.f32 %v397_v57  ;;  %v400_v4 = vmul.f32 0.2, %v350_v61 }
  0xfd   : > { %v408_v5 = vmul.f32 0.2, %v390_v62  ;;  %v671_v6 = vpop.eup %670  ;;  %v426_v7 = vmul.f32 5.0, %v669_v3  ;;  %690 = vtanh.f32 %v405_v58  ;;  %v399_v8 = vmul.f32 0.2, %v345_v1 }
  0xfe   : > { %v407_v9 = vmul.f32 0.2, %v385_v2  ;;  %v673_v10 = vpop.eup %672  ;;  %v434_v11 = vmul.f32 5.0, %v671_v6  ;;  %692 = vtanh.f32 %v400_v4 }
  0xff   : > { %v675_v12 = vpop.eup %674  ;;  %442 = vst [vmem:[%s891_s20 + $0x8] sm:$0xff] %v426_v7  ;;  %v425_v13 = vmul.f32 5.0, %v673_v10  ;;  %694 = vtanh.f32 %v408_v5 }
 0x100   : > { %v677_v14 = vpop.eup %676  ;;  %450 = vst [vmem:[%s891_s20 + $0x48] sm:$0xff] %v434_v11  ;;  %v433_v15 = vmul.f32 5.0, %v675_v12  ;;  %696 = vtanh.f32 %v399_v8 }
 0x101   : > { %v679_v16 = vpop.eup %678  ;;  %441 = vst [vmem:[%s891_s20] sm:$0xff] %v425_v13  ;;  %v428_v17 = vmul.f32 5.0, %v677_v14  ;;  %698 = vtanh.f32 %v407_v9 }
 0x102   : > { %v681_v18 = vpop.eup %680  ;;  %449 = vst [vmem:[%s891_s20 + $0x40] sm:$0xff] %v433_v15  ;;  %v436_v19 = vmul.f32 5.0, %v679_v16 }
 0x103   : > { %v683_v20 = vpop.eup %682  ;;  %444 = vst [vmem:[%s891_s20 + $0x18] sm:$0xff] %v428_v17  ;;  %v427_v21 = vmul.f32 5.0, %v681_v18 }
 0x104   : > { %v685_v22 = vpop.eup %684  ;;  %452 = vst [vmem:[%s891_s20 + $0x58] sm:$0xff] %v436_v19  ;;  %v435_v23 = vmul.f32 5.0, %v683_v20 }
 0x105   : > { %v687_v24 = vpop.eup %686  ;;  %443 = vst [vmem:[%s891_s20 + $0x10] sm:$0xff] %v427_v21  ;;  %v430_v25 = vmul.f32 5.0, %v685_v22 }
 0x106   : > { %v689_v26 = vpop.eup %688  ;;  %451 = vst [vmem:[%s891_s20 + $0x50] sm:$0xff] %v435_v23  ;;  %v438_v27 = vmul.f32 5.0, %v687_v24 }
 0x107   : > { %v691_v28 = vpop.eup %690  ;;  %446 = vst [vmem:[%s891_s20 + $0x28] sm:$0xff] %v430_v25  ;;  %v429_v29 = vmul.f32 5.0, %v689_v26 }
 0x108   : > { %v693_v30 = vpop.eup %692  ;;  %454 = vst [vmem:[%s891_s20 + $0x68] sm:$0xff] %v438_v27  ;;  %v437_v31 = vmul.f32 5.0, %v691_v28 }
 0x109   : > { %v695_v32 = vpop.eup %694  ;;  %445 = vst [vmem:[%s891_s20 + $0x20] sm:$0xff] %v429_v29  ;;  %v432_v33 = vmul.f32 5.0, %v693_v30 }
 0x10a   : > { %v697_v34 = vpop.eup %696  ;;  %453 = vst [vmem:[%s891_s20 + $0x60] sm:$0xff] %v437_v31  ;;  %v440_v35 = vmul.f32 5.0, %v695_v32 }
 0x10b   : > { %v699_v36 = vpop.eup %698  ;;  %448 = vst [vmem:[%s891_s20 + $0x38] sm:$0xff] %v432_v33  ;;  %v431_v37 = vmul.f32 5.0, %v697_v34 }
 0x10c   : > { %456 = vst [vmem:[%s891_s20 + $0x78] sm:$0xff] %v440_v35  ;;  %v439_v38 = vmul.f32 5.0, %v699_v36 }
 0x10d   : > { %447 = vst [vmem:[%s891_s20 + $0x30] sm:$0xff] %v431_v37 }
 0x10e   : > { %455 = vst [vmem:[%s891_s20 + $0x70] sm:$0xff] %v439_v38 }
 0x10f   : > { %713 = shalt.err (!%p710_p3)
}
 0x110   : > { %s714_s6 = scalar_lea.hbm %s911_s28, 2048  ;;  %s718_s9 = scalar_lea.hbm %s964_s3, 4096 }
 0x111   : > { %p715_p4 = scmp.ne.s32.totalorder %s911_s28, %s714_s6  ;;  %p719_p9 = scmp.lt.u32.totalorder %s911_s28, %s964_s3 }
 0x112   : > { %p720_p10 = scmp.lt.u32.totalorder %s718_s9, %s714_s6  ;;  %p722_p12 = scmp.lt.u32.totalorder %s714_s6, %s911_s28 }
 0x113   : > { %p716_p7 = pnand %p715_p4, %p825_p5 }
 0x114   : > { %p721_p11 = por %p720_p10, %p719_p9 }
 0x115   : > { %p717_p8 = pneg %p716_p7 }
 0x116   : > { %p723_p13 = por %p722_p12, %p721_p11 }
 0x118   : > { %p724_p0 = pnand %p723_p13, %p717_p8 }
 0x11a   : > { %727 = shalt.err (!%p724_p0)
}
 0x11b   : > { %s765_s17 = smov 128   ;;  %s766_s19 = smov 8  }
 0x11c   : > { %627 = dma.vmem_to_hbm [thread:$0]  (%p825_p5), %s913_s25, 2048, %s911_s28, %s920_s16, %s765_s17, %s765_s17, %s766_s19  }
 0x11d PF: > { %p633_p1 = scmp.ge.s32.totalorder %s762_s15, 2  ;;  %s486_s20 = sand.u32 1, %s750_s12  }
 0x11e   : > { %s487_s24 = scalar_lea.sflag [#allocation3], %s486_s20 }
 0x11f   : > { %p630_p2 = pnand %p633_p1, %p829_p6 }
 0x121   : > { %745 = dma.done.wait (!%p630_p2), %s487_s24, 2048  }
 0x122   : > { %747 = vsyncadd (!%p630_p2), %s487_s24, 4294965248  ;;  %p13_p3 = scmp.ge.s32.totalorder %s812_s18, 4   ;;  %s967_s12 = smov %s754_s13 }
 0x123   : > { %s968_s13 = smov %s758_s14  ;;  %s969_s14 = smov %s823_s21 }
 0x124   : > { %s970_s15 = smov %s812_s18  ;;  %15 = sbr.rel (!%p13_p3) target bundleno = 3 (0x3), region = 67 }
 0x12b   :  { %492 = vsyncpa [#allocation3], 1 }
 0x12c   :  { %494 = vsyncpa [#allocation3 + $0x1], 1 }

</bundles_post_ra>
